<compile_context>
chip_gen: v7x
topology: tpu7x:2x2x1
jax: 0.10.0
libtpu: 0.0.40
codegen_flags: <defaults>
</compile_context>

<pallas_src>
import math
import functools

import jax
import jax.numpy as jnp
from jax.experimental import pallas as pl
from jax.experimental.pallas import tpu as pltpu


# ---------------------------------------------------------------------------
# Host-side helpers (run once per call, outside the kernel).
# ---------------------------------------------------------------------------

def _gauss_weight(L: int, wid: float) -> jnp.ndarray:
    """generate_gauss_weight(L, wid) -> (L, L), faithful to the PyTorch code."""
    center = jnp.arange(L, dtype=jnp.float32)[:, None] / float(L)
    weight = jnp.linspace(0.0, 1.0, L, dtype=jnp.float32)[None, :]
    width = max(float(wid), 0.01) / 9.0
    w = 0.3989422804014327
    g = (w / width) * jnp.exp(-((weight - center) ** 2) / (2.0 * width * width))
    return g / jnp.max(g, axis=-1, keepdims=True)


def _vmem_capacity_bytes() -> int:
    try:
        info = pltpu.get_tpu_info()
        cap = getattr(info, "vmem_capacity_bytes", None)
        if cap:
            return int(cap)
    except Exception:
        pass
    return 128 * 1024 * 1024  # conservative v5e/v6e assumption


def _pick_q_tile(Lq: int, vmem_cap: int) -> int:
    small_vmem = vmem_cap <= 64 * 1024 * 1024          # e.g. v7x
    prefs = (256, 128) if small_vmem else (512, 256, 128)
    for t in prefs:
        if Lq % t == 0:
            return t
    return Lq  # full extent (always a legal block)


def _heads_per_group(H: int, d: int) -> int:
    """Smallest head-packing factor giving a 128-lane-multiple output width,
    falling back to all heads (width == D, always a legal full-dim block)."""
    for hp in range(1, H + 1):
        if H % hp == 0 and (hp * d) % 128 == 0:
            return hp
    return H


# ---------------------------------------------------------------------------
# Kernel: one (batch, q_tile, head_group) step.
# ---------------------------------------------------------------------------

def _attn_kernel(q_ref, wq_ref, bq_ref, kt_ref, v_ref, *rest,
                 heads_per_step: int, head_size: int,
                 use_gauss: bool, has_mask: bool):
    idx = 0
    mask_ref = None
    gmm_ref = None
    if has_mask:
        mask_ref = rest[idx]; idx += 1
    if use_gauss:
        gmm_ref = rest[idx]; idx += 1
    o_ref = rest[idx]

    d = head_size

    # Query projection for the whole head group in one wide MXU matmul.
    # (1/sqrt(d) is pre-folded into wq/bq on the host; q is already bf16.)
    q16 = q_ref[0]                                                  # (tq, D) bf16
    qh = jnp.dot(q16, wq_ref[0],
                 preferred_element_type=jnp.float32) + bq_ref[0]    # (tq, W) f32

    add = mask_ref[0].astype(jnp.float32) if has_mask else None     # (tq, L)
    gmm = gmm_ref[...].astype(jnp.float32) if use_gauss else None   # (tq, L)

    ctx_parts = []
    for j in range(heads_per_step):                                 # static unroll
        qj = qh[:, j * d:(j + 1) * d].astype(jnp.bfloat16)          # (tq, d)
        # scores: plain NN dot against the pre-transposed (d, L) key block.
        s = jnp.dot(qj, kt_ref[0, j],
                    preferred_element_type=jnp.float32)             # (tq, L) f32
        # fused Gaussian weighting + additive attention mask (one VPU pass).
        if use_gauss and has_mask:
            s = s * gmm + add
        elif use_gauss:
            s = s * gmm
        elif has_mask:
            s = s + add
        # softmax over keys: EUP exp + approx reciprocal.
        s = s - jnp.max(s, axis=-1, keepdims=True)
        p = jnp.exp(s)
        p = p * pl.reciprocal(jnp.sum(p, axis=-1, keepdims=True), approx=True)
        # TODO(synk): attention-probs dropout omitted (inference-mode identity).
        ctx_parts.append(jnp.dot(p.astype(jnp.bfloat16), v_ref[0, j],
                                 preferred_element_type=jnp.float32))   # (tq, d)

    ctx = ctx_parts[0] if heads_per_step == 1 else jnp.concatenate(ctx_parts, axis=-1)
    o_ref[0] = ctx.astype(o_ref.dtype)                              # (tq, W) lane-dense


# ---------------------------------------------------------------------------
# Wrapper.
# ---------------------------------------------------------------------------

def euclidean_gaussian_attention(query_states, key_states, value_states,
                                 attention_mask, params, *, num_heads: int, wid):
    """params = dict(wq, bq, wk, bk, wv, bv); w* are (D_in, D_out), b* are (1, D)."""
    N, Lq, D = query_states.shape
    L = key_states.shape[1]
    assert D % num_heads == 0
    d = D // num_heads
    use_gauss = wid is not None
    has_mask = attention_mask is not None
    if use_gauss and Lq != L:
        raise ValueError("Gaussian weighting (wid is not None) requires Lq == L "
                         "(same assumption as the PyTorch module).")

    vmem_cap = _vmem_capacity_bytes()
    tq = _pick_q_tile(Lq, vmem_cap)
    nq = Lq // tq
    hp = _heads_per_group(num_heads, d)            # heads packed per grid step
    G = num_heads // hp                            # head groups (innermost grid axis)
    W = hp * d                                     # per-step output width (>=128 or ==D)

    scale = 1.0 / math.sqrt(d)

    # --- packed, pre-scaled query projection params (per head group) ---------
    wq_packed = (params["wq"].reshape(D, G, W).transpose(1, 0, 2) * scale
                 ).astype(jnp.bfloat16)                               # (G, D, W)
    bq_packed = (params["bq"].reshape(1, G, W).transpose(1, 0, 2) * scale
                 ).astype(jnp.float32)                                # (G, 1, W)

    # --- hoisted K/V head projections: one large bf16 matmul each ------------
    k16 = key_states.astype(jnp.bfloat16)
    v16 = value_states.astype(jnp.bfloat16)
    wk = params["wk"].astype(jnp.bfloat16).reshape(D, num_heads, d)
    wv = params["wv"].astype(jnp.bfloat16).reshape(D, num_heads, d)
    bk = params["bk"].reshape(num_heads, d).astype(jnp.float32)
    bv = params["bv"].reshape(num_heads, d).astype(jnp.float32)
    kh = jnp.einsum('nld,dhe->nhle', k16, wk,
                    preferred_element_type=jnp.float32) + bk[None, :, None, :]
    vh = jnp.einsum('nld,dhe->nhle', v16, wv,
                    preferred_element_type=jnp.float32) + bv[None, :, None, :]
    kt = jnp.transpose(kh, (0, 1, 3, 2)).astype(jnp.bfloat16)         # (N, H, d, L)
    vh = vh.astype(jnp.bfloat16)                                      # (N, H, L, d)

    q16 = query_states.astype(jnp.bfloat16)                           # (N, Lq, D)

    in_specs = [
        pl.BlockSpec((1, tq, D), lambda b, qi, g: (b, qi, 0)),        # Q (head-invariant)
        pl.BlockSpec((1, D, W), lambda b, qi, g: (g, 0, 0)),          # Wq (packed group)
        pl.BlockSpec((1, 1, W), lambda b, qi, g: (g, 0, 0)),          # bq (packed group)
        pl.BlockSpec((1, hp, d, L), lambda b, qi, g: (b, g, 0, 0)),   # K^T per head group
        pl.BlockSpec((1, hp, L, d), lambda b, qi, g: (b, g, 0, 0)),   # V per head group
    ]
    args = [q16, wq_packed, bq_packed, kt, vh]

    if has_mask:
        # precomputed additive mask, bf16 (0 / -10000 values, exact masking effect).
        mask_add = ((attention_mask.astype(jnp.float32) - 1.0) * 10000.0
                    ).astype(jnp.bfloat16)                            # (N, Lq, L)
        in_specs.append(pl.BlockSpec((1, tq, L), lambda b, qi, g: (b, qi, 0)))
        args.append(mask_add)

    if use_gauss:
        # batch/head-invariant Gaussian weights, computed once, streamed bf16.
        gmm = _gauss_weight(L, wid).astype(jnp.bfloat16)              # (Lq, L)
        in_specs.append(pl.BlockSpec((tq, L), lambda b, qi, g: (qi, 0)))
        args.append(gmm)

    kernel = functools.partial(_attn_kernel, heads_per_step=hp, head_size=d,
                               use_gauss=use_gauss, has_mask=has_mask)

    out = pl.pallas_call(
        kernel,
        out_shape=jax.ShapeDtypeStruct((N, Lq, D), jnp.float32),      # merged layout
        grid_spec=pltpu.PrefetchScalarGridSpec(
            num_scalar_prefetch=0,
            grid=(N, nq, G),                                          # head axis innermost
            in_specs=in_specs,
            out_specs=pl.BlockSpec((1, tq, W), lambda b, qi, g: (b, qi, g)),
        ),
        compiler_params=pltpu.CompilerParams(
            dimension_semantics=("parallel", "parallel", "arbitrary"),
            vmem_limit_bytes=min(64 * 1024 * 1024, (3 * vmem_cap) // 4),
        ),
    )(*args)

    return out  # already (N, Lq, D); no wrapper transpose needed.


# ---------------------------------------------------------------------------
# Pure-JAX reference mirroring the PyTorch math and the kernel's precision
# choices (bf16 MXU operands, f32 accumulation / elementwise).
# ---------------------------------------------------------------------------

def _reference(query_states, key_states, value_states, attention_mask, params,
               *, num_heads: int, wid):
    N, Lq, D = query_states.shape
    L = key_states.shape[1]
    d = D // num_heads
    scale = 1.0 / math.sqrt(d)

    q16 = query_states.astype(jnp.bfloat16)
    k16 = key_states.astype(jnp.bfloat16)
    v16 = value_states.astype(jnp.bfloat16)

    wq = (params["wq"].reshape(D, num_heads, d) * scale).astype(jnp.bfloat16)
    bq = params["bq"].reshape(num_heads, d) * scale
    wk = params["wk"].reshape(D, num_heads, d).astype(jnp.bfloat16)
    bk = params["bk"].reshape(num_heads, d)
    wv = params["wv"].reshape(D, num_heads, d).astype(jnp.bfloat16)
    bv = params["bv"].reshape(num_heads, d)

    Q = jnp.einsum('nld,dhe->nhle', q16, wq,
                   preferred_element_type=jnp.float32) + bq[None, :, None, :]
    K = jnp.einsum('nld,dhe->nhle', k16, wk,
                   preferred_element_type=jnp.float32) + bk[None, :, None, :]
    V = jnp.einsum('nld,dhe->nhle', v16, wv,
                   preferred_element_type=jnp.float32) + bv[None, :, None, :]

    s = jnp.einsum('nhqe,nhke->nhqk', Q.astype(jnp.bfloat16), K.astype(jnp.bfloat16),
                   preferred_element_type=jnp.float32)
    if wid is not None:
        gmm = _gauss_weight(L, wid).astype(jnp.bfloat16).astype(jnp.float32)
        s = s * gmm[None, None]
    if attention_mask is not None:
        add = ((attention_mask.astype(jnp.float32) - 1.0) * 10000.0
               ).astype(jnp.bfloat16).astype(jnp.float32)
        s = s + add[:, None]
    p = jax.nn.softmax(s, axis=-1)
    ctx = jnp.einsum('nhqk,nhke->nhqe', p.astype(jnp.bfloat16), V.astype(jnp.bfloat16),
                     preferred_element_type=jnp.float32)
    return ctx.transpose(0, 2, 1, 3).reshape(N, Lq, D)


if __name__ == "__main__":
    # Small config consistent with the module: hidden_size=32, num_heads=4, seq=8.
    N, L, D, H = 2, 8, 32, 4
    WID = 0.5

    key = jax.random.PRNGKey(0)
    ks = jax.random.split(key, 10)
    scale = 1.0 / math.sqrt(D)

    params = {
        "wq": jax.random.normal(ks[0], (D, D), jnp.float32) * scale,
        "bq": jax.random.normal(ks[1], (1, D), jnp.float32) * 0.01,
        "wk": jax.random.normal(ks[2], (D, D), jnp.float32) * scale,
        "bk": jax.random.normal(ks[3], (1, D), jnp.float32) * 0.01,
        "wv": jax.random.normal(ks[4], (D, D), jnp.float32) * scale,
        "bv": jax.random.normal(ks[5], (1, D), jnp.float32) * 0.01,
    }

    query_states = jax.random.normal(ks[6], (N, L, D), jnp.float32)
    key_states = jax.random.normal(ks[7], (N, L, D), jnp.float32)
    value_states = jax.random.normal(ks[8], (N, L, D), jnp.float32)
    # Binary attention mask (N, Lq, L): mask out the last 2 keys for batch 1.
    attention_mask = jnp.ones((N, L, L), jnp.float32)
    attention_mask = attention_mask.at[1, :, -2:].set(0.0)

    out = euclidean_gaussian_attention(query_states, key_states, value_states,
                                       attention_mask, params, num_heads=H, wid=WID)
    out = jax.block_until_ready(out)

    ref = _reference(query_states, key_states, value_states, attention_mask, params,
                     num_heads=H, wid=WID)
    assert out.shape == (N, L, D)
    # Tolerance accounts for the EUP approx-reciprocal softmax denominator and
    # f32 accumulation-order differences (matmul operand precision matches).
    assert jnp.allclose(out, ref, atol=2e-2, rtol=2e-2), (
        f"mismatch vs reference, max abs err = {float(jnp.max(jnp.abs(out - ref)))}")

    print("KERNEL_OK")
</pallas_src>

<mosaic_0001>
module attributes {stable_mosaic.version = 11 : i64} {
  func.func @_attn_kernel(%arg0: i32, %arg1: i32, %arg2: i32, %arg3: memref<1x8x32xbf16, #tpu.memory_space<vmem>>, %arg4: memref<1x32x32xbf16, #tpu.memory_space<vmem>>, %arg5: memref<1x1x32xf32, #tpu.memory_space<vmem>>, %arg6: memref<1x4x8x8xbf16, #tpu.memory_space<vmem>>, %arg7: memref<1x4x8x8xbf16, #tpu.memory_space<vmem>>, %arg8: memref<1x8x8xbf16, #tpu.memory_space<vmem>>, %arg9: memref<8x8xbf16, #tpu.memory_space<vmem>>, %arg10: memref<1x8x32xf32, #tpu.memory_space<vmem>>) attributes {dimension_semantics = [#tpu.dimension_semantics<parallel>, #tpu.dimension_semantics<parallel>, #tpu.dimension_semantics<arbitrary>], iteration_bounds = array<i64: 2, 1, 1>, scalar_prefetch = 0 : i64, scratch_operands = 0 : i64, tpu.core_type = #tpu.core_type<tc>, window_params = [{transform_indices = @transform_0, window_bounds = array<i64: 1, 8, 32>}, {transform_indices = @transform_1, window_bounds = array<i64: 1, 32, 32>}, {transform_indices = @transform_2, window_bounds = array<i64: 1, 1, 32>}, {transform_indices = @transform_3, window_bounds = array<i64: 1, 4, 8, 8>}, {transform_indices = @transform_4, window_bounds = array<i64: 1, 4, 8, 8>}, {transform_indices = @transform_5, window_bounds = array<i64: 1, 8, 8>}, {transform_indices = @transform_6, window_bounds = array<i64: 8, 8>}, {transform_indices = @transform_7, window_bounds = array<i64: 1, 8, 32>}]} {
    %c0 = arith.constant 0 : index
    %c0_0 = arith.constant 0 : index
    %c0_1 = arith.constant 0 : index
    %0 = vector.load %arg3[%c0, %c0_0, %c0_1] : memref<1x8x32xbf16, #tpu.memory_space<vmem>>, vector<1x8x32xbf16>
    %1 = vector.shape_cast %0 : vector<1x8x32xbf16> to vector<8x32xbf16>
    %c0_2 = arith.constant 0 : index
    %c0_3 = arith.constant 0 : index
    %c0_4 = arith.constant 0 : index
    %2 = vector.load %arg4[%c0_2, %c0_3, %c0_4] : memref<1x32x32xbf16, #tpu.memory_space<vmem>>, vector<1x32x32xbf16>
    %3 = vector.shape_cast %2 : vector<1x32x32xbf16> to vector<32x32xbf16>
    %cst = arith.constant dense<0.000000e+00> : vector<8x32xf32>
    %4 = tpu.matmul %1, %3, %cst {dimension_numbers = #tpu.dot_dimension_numbers<[1], [0], [0], [1], [0, 0, 1, 1], [], []>} : vector<8x32xbf16>, vector<32x32xbf16>, vector<8x32xf32> -> vector<8x32xf32>
    %c0_5 = arith.constant 0 : index
    %c0_6 = arith.constant 0 : index
    %c0_7 = arith.constant 0 : index
    %5 = vector.load %arg5[%c0_5, %c0_6, %c0_7] : memref<1x1x32xf32, #tpu.memory_space<vmem>>, vector<1x1x32xf32>
    %6 = vector.shape_cast %5 : vector<1x1x32xf32> to vector<1x32xf32>
    %7 = vector.broadcast %6 : vector<1x32xf32> to vector<8x32xf32>
    %8 = arith.addf %4, %7 : vector<8x32xf32>
    %c0_8 = arith.constant 0 : index
    %c0_9 = arith.constant 0 : index
    %c0_10 = arith.constant 0 : index
    %9 = vector.load %arg8[%c0_8, %c0_9, %c0_10] : memref<1x8x8xbf16, #tpu.memory_space<vmem>>, vector<1x8x8xbf16>
    %10 = vector.shape_cast %9 : vector<1x8x8xbf16> to vector<8x8xbf16>
    %11 = arith.extf %10 : vector<8x8xbf16> to vector<8x8xf32>
    %c0_11 = arith.constant 0 : index
    %c0_12 = arith.constant 0 : index
    %12 = vector.load %arg9[%c0_11, %c0_12] : memref<8x8xbf16, #tpu.memory_space<vmem>>, vector<8x8xbf16>
    %13 = arith.extf %12 : vector<8x8xbf16> to vector<8x8xf32>
    %14 = vector.extract_strided_slice %8 {offsets = [0, 0], sizes = [8, 8], strides = [1, 1]} : vector<8x32xf32> to vector<8x8xf32>
    %15 = arith.truncf %14 : vector<8x8xf32> to vector<8x8xbf16>
    %c0_13 = arith.constant 0 : index
    %c0_14 = arith.constant 0 : index
    %c0_15 = arith.constant 0 : index
    %c0_16 = arith.constant 0 : index
    %16 = vector.load %arg6[%c0_13, %c0_14, %c0_15, %c0_16] : memref<1x4x8x8xbf16, #tpu.memory_space<vmem>>, vector<1x1x8x8xbf16>
    %17 = vector.shape_cast %16 : vector<1x1x8x8xbf16> to vector<8x8xbf16>
    %cst_17 = arith.constant dense<0.000000e+00> : vector<8x8xf32>
    %18 = tpu.matmul %15, %17, %cst_17 {dimension_numbers = #tpu.dot_dimension_numbers<[1], [0], [0], [1], [0, 0, 1, 1], [], []>} : vector<8x8xbf16>, vector<8x8xbf16>, vector<8x8xf32> -> vector<8x8xf32>
    %19 = arith.mulf %18, %13 : vector<8x8xf32>
    %20 = arith.addf %19, %11 : vector<8x8xf32>
    %cst_18 = arith.constant dense<0xFF800000> : vector<8xf32>
    %21 = vector.multi_reduction <maximumf>, %20, %cst_18 [1] : vector<8x8xf32> to vector<8xf32>
    %22 = vector.shape_cast %21 : vector<8xf32> to vector<8x1xf32>
    %23 = vector.broadcast %22 : vector<8x1xf32> to vector<8x8xf32>
    %24 = arith.subf %20, %23 : vector<8x8xf32>
    %25 = math.exp %24 : vector<8x8xf32>
    %cst_19 = arith.constant dense<0.000000e+00> : vector<8xf32>
    %26 = vector.multi_reduction <add>, %25, %cst_19 [1] : vector<8x8xf32> to vector<8xf32>
    %27 = vector.shape_cast %26 : vector<8xf32> to vector<8x1xf32>
    %28 = tpu.reciprocal %27 {approx = true} : vector<8x1xf32> -> vector<8x1xf32>
    %29 = vector.broadcast %28 : vector<8x1xf32> to vector<8x8xf32>
    %30 = arith.mulf %25, %29 : vector<8x8xf32>
    %31 = arith.truncf %30 : vector<8x8xf32> to vector<8x8xbf16>
    %c0_20 = arith.constant 0 : index
    %c0_21 = arith.constant 0 : index
    %c0_22 = arith.constant 0 : index
    %c0_23 = arith.constant 0 : index
    %32 = vector.load %arg7[%c0_20, %c0_21, %c0_22, %c0_23] : memref<1x4x8x8xbf16, #tpu.memory_space<vmem>>, vector<1x1x8x8xbf16>
    %33 = vector.shape_cast %32 : vector<1x1x8x8xbf16> to vector<8x8xbf16>
    %cst_24 = arith.constant dense<0.000000e+00> : vector<8x8xf32>
    %34 = tpu.matmul %31, %33, %cst_24 {dimension_numbers = #tpu.dot_dimension_numbers<[1], [0], [0], [1], [0, 0, 1, 1], [], []>} : vector<8x8xbf16>, vector<8x8xbf16>, vector<8x8xf32> -> vector<8x8xf32>
    %35 = vector.extract_strided_slice %8 {offsets = [0, 8], sizes = [8, 8], strides = [1, 1]} : vector<8x32xf32> to vector<8x8xf32>
    %36 = arith.truncf %35 : vector<8x8xf32> to vector<8x8xbf16>
    %c0_25 = arith.constant 0 : index
    %c1 = arith.constant 1 : index
    %c0_26 = arith.constant 0 : index
    %c0_27 = arith.constant 0 : index
    %37 = vector.load %arg6[%c0_25, %c1, %c0_26, %c0_27] : memref<1x4x8x8xbf16, #tpu.memory_space<vmem>>, vector<1x1x8x8xbf16>
    %38 = vector.shape_cast %37 : vector<1x1x8x8xbf16> to vector<8x8xbf16>
    %cst_28 = arith.constant dense<0.000000e+00> : vector<8x8xf32>
    %39 = tpu.matmul %36, %38, %cst_28 {dimension_numbers = #tpu.dot_dimension_numbers<[1], [0], [0], [1], [0, 0, 1, 1], [], []>} : vector<8x8xbf16>, vector<8x8xbf16>, vector<8x8xf32> -> vector<8x8xf32>
    %40 = arith.mulf %39, %13 : vector<8x8xf32>
    %41 = arith.addf %40, %11 : vector<8x8xf32>
    %cst_29 = arith.constant dense<0xFF800000> : vector<8xf32>
    %42 = vector.multi_reduction <maximumf>, %41, %cst_29 [1] : vector<8x8xf32> to vector<8xf32>
    %43 = vector.shape_cast %42 : vector<8xf32> to vector<8x1xf32>
    %44 = vector.broadcast %43 : vector<8x1xf32> to vector<8x8xf32>
    %45 = arith.subf %41, %44 : vector<8x8xf32>
    %46 = math.exp %45 : vector<8x8xf32>
    %cst_30 = arith.constant dense<0.000000e+00> : vector<8xf32>
    %47 = vector.multi_reduction <add>, %46, %cst_30 [1] : vector<8x8xf32> to vector<8xf32>
    %48 = vector.shape_cast %47 : vector<8xf32> to vector<8x1xf32>
    %49 = tpu.reciprocal %48 {approx = true} : vector<8x1xf32> -> vector<8x1xf32>
    %50 = vector.broadcast %49 : vector<8x1xf32> to vector<8x8xf32>
    %51 = arith.mulf %46, %50 : vector<8x8xf32>
    %52 = arith.truncf %51 : vector<8x8xf32> to vector<8x8xbf16>
    %c0_31 = arith.constant 0 : index
    %c1_32 = arith.constant 1 : index
    %c0_33 = arith.constant 0 : index
    %c0_34 = arith.constant 0 : index
    %53 = vector.load %arg7[%c0_31, %c1_32, %c0_33, %c0_34] : memref<1x4x8x8xbf16, #tpu.memory_space<vmem>>, vector<1x1x8x8xbf16>
    %54 = vector.shape_cast %53 : vector<1x1x8x8xbf16> to vector<8x8xbf16>
    %cst_35 = arith.constant dense<0.000000e+00> : vector<8x8xf32>
    %55 = tpu.matmul %52, %54, %cst_35 {dimension_numbers = #tpu.dot_dimension_numbers<[1], [0], [0], [1], [0, 0, 1, 1], [], []>} : vector<8x8xbf16>, vector<8x8xbf16>, vector<8x8xf32> -> vector<8x8xf32>
    %56 = vector.extract_strided_slice %8 {offsets = [0, 16], sizes = [8, 8], strides = [1, 1]} : vector<8x32xf32> to vector<8x8xf32>
    %57 = arith.truncf %56 : vector<8x8xf32> to vector<8x8xbf16>
    %c0_36 = arith.constant 0 : index
    %c2 = arith.constant 2 : index
    %c0_37 = arith.constant 0 : index
    %c0_38 = arith.constant 0 : index
    %58 = vector.load %arg6[%c0_36, %c2, %c0_37, %c0_38] : memref<1x4x8x8xbf16, #tpu.memory_space<vmem>>, vector<1x1x8x8xbf16>
    %59 = vector.shape_cast %58 : vector<1x1x8x8xbf16> to vector<8x8xbf16>
    %cst_39 = arith.constant dense<0.000000e+00> : vector<8x8xf32>
    %60 = tpu.matmul %57, %59, %cst_39 {dimension_numbers = #tpu.dot_dimension_numbers<[1], [0], [0], [1], [0, 0, 1, 1], [], []>} : vector<8x8xbf16>, vector<8x8xbf16>, vector<8x8xf32> -> vector<8x8xf32>
    %61 = arith.mulf %60, %13 : vector<8x8xf32>
    %62 = arith.addf %61, %11 : vector<8x8xf32>
    %cst_40 = arith.constant dense<0xFF800000> : vector<8xf32>
    %63 = vector.multi_reduction <maximumf>, %62, %cst_40 [1] : vector<8x8xf32> to vector<8xf32>
    %64 = vector.shape_cast %63 : vector<8xf32> to vector<8x1xf32>
    %65 = vector.broadcast %64 : vector<8x1xf32> to vector<8x8xf32>
    %66 = arith.subf %62, %65 : vector<8x8xf32>
    %67 = math.exp %66 : vector<8x8xf32>
    %cst_41 = arith.constant dense<0.000000e+00> : vector<8xf32>
    %68 = vector.multi_reduction <add>, %67, %cst_41 [1] : vector<8x8xf32> to vector<8xf32>
    %69 = vector.shape_cast %68 : vector<8xf32> to vector<8x1xf32>
    %70 = tpu.reciprocal %69 {approx = true} : vector<8x1xf32> -> vector<8x1xf32>
    %71 = vector.broadcast %70 : vector<8x1xf32> to vector<8x8xf32>
    %72 = arith.mulf %67, %71 : vector<8x8xf32>
    %73 = arith.truncf %72 : vector<8x8xf32> to vector<8x8xbf16>
    %c0_42 = arith.constant 0 : index
    %c2_43 = arith.constant 2 : index
    %c0_44 = arith.constant 0 : index
    %c0_45 = arith.constant 0 : index
    %74 = vector.load %arg7[%c0_42, %c2_43, %c0_44, %c0_45] : memref<1x4x8x8xbf16, #tpu.memory_space<vmem>>, vector<1x1x8x8xbf16>
    %75 = vector.shape_cast %74 : vector<1x1x8x8xbf16> to vector<8x8xbf16>
    %cst_46 = arith.constant dense<0.000000e+00> : vector<8x8xf32>
    %76 = tpu.matmul %73, %75, %cst_46 {dimension_numbers = #tpu.dot_dimension_numbers<[1], [0], [0], [1], [0, 0, 1, 1], [], []>} : vector<8x8xbf16>, vector<8x8xbf16>, vector<8x8xf32> -> vector<8x8xf32>
    %77 = vector.extract_strided_slice %8 {offsets = [0, 24], sizes = [8, 8], strides = [1, 1]} : vector<8x32xf32> to vector<8x8xf32>
    %78 = arith.truncf %77 : vector<8x8xf32> to vector<8x8xbf16>
    %c0_47 = arith.constant 0 : index
    %c3 = arith.constant 3 : index
    %c0_48 = arith.constant 0 : index
    %c0_49 = arith.constant 0 : index
    %79 = vector.load %arg6[%c0_47, %c3, %c0_48, %c0_49] : memref<1x4x8x8xbf16, #tpu.memory_space<vmem>>, vector<1x1x8x8xbf16>
    %80 = vector.shape_cast %79 : vector<1x1x8x8xbf16> to vector<8x8xbf16>
    %cst_50 = arith.constant dense<0.000000e+00> : vector<8x8xf32>
    %81 = tpu.matmul %78, %80, %cst_50 {dimension_numbers = #tpu.dot_dimension_numbers<[1], [0], [0], [1], [0, 0, 1, 1], [], []>} : vector<8x8xbf16>, vector<8x8xbf16>, vector<8x8xf32> -> vector<8x8xf32>
    %82 = arith.mulf %81, %13 : vector<8x8xf32>
    %83 = arith.addf %82, %11 : vector<8x8xf32>
    %cst_51 = arith.constant dense<0xFF800000> : vector<8xf32>
    %84 = vector.multi_reduction <maximumf>, %83, %cst_51 [1] : vector<8x8xf32> to vector<8xf32>
    %85 = vector.shape_cast %84 : vector<8xf32> to vector<8x1xf32>
    %86 = vector.broadcast %85 : vector<8x1xf32> to vector<8x8xf32>
    %87 = arith.subf %83, %86 : vector<8x8xf32>
    %88 = math.exp %87 : vector<8x8xf32>
    %cst_52 = arith.constant dense<0.000000e+00> : vector<8xf32>
    %89 = vector.multi_reduction <add>, %88, %cst_52 [1] : vector<8x8xf32> to vector<8xf32>
    %90 = vector.shape_cast %89 : vector<8xf32> to vector<8x1xf32>
    %91 = tpu.reciprocal %90 {approx = true} : vector<8x1xf32> -> vector<8x1xf32>
    %92 = vector.broadcast %91 : vector<8x1xf32> to vector<8x8xf32>
    %93 = arith.mulf %88, %92 : vector<8x8xf32>
    %94 = arith.truncf %93 : vector<8x8xf32> to vector<8x8xbf16>
    %c0_53 = arith.constant 0 : index
    %c3_54 = arith.constant 3 : index
    %c0_55 = arith.constant 0 : index
    %c0_56 = arith.constant 0 : index
    %95 = vector.load %arg7[%c0_53, %c3_54, %c0_55, %c0_56] : memref<1x4x8x8xbf16, #tpu.memory_space<vmem>>, vector<1x1x8x8xbf16>
    %96 = vector.shape_cast %95 : vector<1x1x8x8xbf16> to vector<8x8xbf16>
    %cst_57 = arith.constant dense<0.000000e+00> : vector<8x8xf32>
    %97 = tpu.matmul %94, %96, %cst_57 {dimension_numbers = #tpu.dot_dimension_numbers<[1], [0], [0], [1], [0, 0, 1, 1], [], []>} : vector<8x8xbf16>, vector<8x8xbf16>, vector<8x8xf32> -> vector<8x8xf32>
    %98 = tpu.concatenate %34, %55, %76, %97 in 1 : vector<8x8xf32>, vector<8x8xf32>, vector<8x8xf32>, vector<8x8xf32> -> vector<8x32xf32>
    %c0_58 = arith.constant 0 : index
    %c0_59 = arith.constant 0 : index
    %c0_60 = arith.constant 0 : index
    %99 = vector.load %arg10[%c0_58, %c0_59, %c0_60] : memref<1x8x32xf32, #tpu.memory_space<vmem>>, vector<1x8x32xf32>
    %100 = vector.shape_cast %99 : vector<1x8x32xf32> to vector<8x32xf32>
    %101 = vector.shape_cast %98 : vector<8x32xf32> to vector<1x8x32xf32>
    tpu.vector_store %arg10[%c0_58, %c0_59, %c0_60], %101 {strides = array<i32>} : memref<1x8x32xf32, #tpu.memory_space<vmem>>, vector<1x8x32xf32>,
    return
  }
  func.func @transform_0(%arg0: i32, %arg1: i32, %arg2: i32) -> (i32, i32, i32) {
    %c0_i32 = arith.constant 0 : i32
    %c0_i32_0 = arith.constant 0 : i32
    return %arg0, %arg1, %c0_i32 : i32, i32, i32
  }
  func.func @transform_1(%arg0: i32, %arg1: i32, %arg2: i32) -> (i32, i32, i32) {
    %c0_i32 = arith.constant 0 : i32
    %c0_i32_0 = arith.constant 0 : i32
    %c0_i32_1 = arith.constant 0 : i32
    return %arg2, %c0_i32, %c0_i32_0 : i32, i32, i32
  }
  func.func @transform_2(%arg0: i32, %arg1: i32, %arg2: i32) -> (i32, i32, i32) {
    %c0_i32 = arith.constant 0 : i32
    %c0_i32_0 = arith.constant 0 : i32
    %c0_i32_1 = arith.constant 0 : i32
    return %arg2, %c0_i32, %c0_i32_0 : i32, i32, i32
  }
  func.func @transform_3(%arg0: i32, %arg1: i32, %arg2: i32) -> (i32, i32, i32, i32) {
    %c0_i32 = arith.constant 0 : i32
    %c0_i32_0 = arith.constant 0 : i32
    %c0_i32_1 = arith.constant 0 : i32
    return %arg0, %arg2, %c0_i32, %c0_i32_0 : i32, i32, i32, i32
  }
  func.func @transform_4(%arg0: i32, %arg1: i32, %arg2: i32) -> (i32, i32, i32, i32) {
    %c0_i32 = arith.constant 0 : i32
    %c0_i32_0 = arith.constant 0 : i32
    %c0_i32_1 = arith.constant 0 : i32
    return %arg0, %arg2, %c0_i32, %c0_i32_0 : i32, i32, i32, i32
  }
  func.func @transform_5(%arg0: i32, %arg1: i32, %arg2: i32) -> (i32, i32, i32) {
    %c0_i32 = arith.constant 0 : i32
    %c0_i32_0 = arith.constant 0 : i32
    return %arg0, %arg1, %c0_i32 : i32, i32, i32
  }
  func.func @transform_6(%arg0: i32, %arg1: i32, %arg2: i32) -> (i32, i32) {
    %c0_i32 = arith.constant 0 : i32
    %c0_i32_0 = arith.constant 0 : i32
    return %arg1, %c0_i32 : i32, i32
  }
  func.func @transform_7(%arg0: i32, %arg1: i32, %arg2: i32) -> (i32, i32, i32) {
    %c0_i32 = arith.constant 0 : i32
    return %arg0, %arg1, %arg2 : i32, i32, i32
  }
}

</mosaic_0001>

<bundles_post_ra>
// kernel: tpu_custom_call.1
= control target key start
LH: loop header
LB: loop body
LE: loop exit
PB: predicated region body
PF: predicated region fallthrough
CT: control target
= control target key end

     0   :  { %s2348_s0 = inlined_call_operand.hbm [shape: bf16[2,8,32], index: 0, kind: input, shape index: {}]   ;;  %s2349_s1 = inlined_call_operand.hbm [shape: bf16[1,32,32], index: 1, kind: input, shape index: {}]   ;;  %s2350_s2 = inlined_call_operand.hbm [shape: f32[1,1,32], index: 2, kind: input, shape index: {}]   ;;  %s2351_s3 = inlined_call_operand.hbm [shape: bf16[2,4,8,8], index: 3, kind: input, shape index: {}]   ;;  %s2352_s4 = inlined_call_operand.hbm [shape: bf16[2,4,8,8], index: 4, kind: input, shape index: {}]   ;;  %s2353_s5 = inlined_call_operand.hbm [shape: bf16[2,8,8], index: 5, kind: input, shape index: {}]   ;;  %s2354_s6 = inlined_call_operand.hbm [shape: bf16[8,8], index: 6, kind: input, shape index: {}]   ;;  %s2355_s7 = inlined_call_operand.hbm [shape: f32[2,8,32], index: 7, kind: output, shape index: {}]  }
   0x1   :  { %2384 = sst [smem:[#allocation30_spill]] %s2349_s1 }
   0x2   :  { %2385 = sst [smem:[#allocation31_spill]] %s2351_s3 }
   0x3   :  { %2386 = sst [smem:[#allocation32_spill]] %s2354_s6 }
   0x4   :  { %2387 = sst [smem:[#allocation33_spill]] %s2355_s7 }
   0x5   :  { %12 = vsyncpa [#allocation3], 0 }
   0x6   :  { %14 = vsyncpa [#allocation3 + $0x1], 0 }
   0x7   :  { %15 = vsyncpa [#allocation6], 0 }
   0x8   :  { %16 = vsyncpa [#allocation9], 0 }
   0x9   :  { %18 = vsyncpa [#allocation9 + $0x1], 0 }
   0xa   :  { %19 = vsyncpa [#allocation12], 0 }
   0xb   :  { %21 = vsyncpa [#allocation12 + $0x1], 0 }
   0xc   :  { %22 = vsyncpa [#allocation4], 0 }
   0xd   :  { %24 = vsyncpa [#allocation4 + $0x1], 0  ;;  %s1877_s24 = smov 0   ;;  %s1879_s25 = smov 0  }
   0xe   :  { %s1881_s26 = smov 0   ;;  %s1883_s27 = smov 0  }
   0xf   :  { %s1885_s28 = smov 0   ;;  %s1887_s29 = smov 0  }
  0x10 LB: > { %2388 = sst [smem:[#allocation21_spill]] %s1797_s24  ;;  %s1908_s30 = sadd.s32 4294967295, %s1817_s29   ;;  %s1817_s29 = sphi %s1887_s29, %s30_s29   ;;  %s1813_s28 = sphi %s1885_s28, %s2443_s28   ;;  %s1809_s27 = sphi %s1883_s27, %s2442_s27   ;;  %s1805_s26 = sphi %s1881_s26, %s2438_s26   ;;  %s1801_s25 = sphi %s1879_s25, %s2441_s25   ;;  %s1797_s24 = sphi %s1877_s24, %s2440_s24  }
  0x11   : > { %2389 = sst [smem:[#allocation22_spill]] %s1805_s26  ;;  %s1255_s8 = sadd.s32 4294967294, %s1817_s29  }
  0x12   : > { %2390 = sst [smem:[#allocation23_spill]] %s1809_s27  ;;  %p65_p0 = scmp.ne.s32.totalorder %s1805_s26, %s1801_s25 }
  0x13   : > { %2391 = sst [smem:[#allocation24_spill]] %s1908_s30  ;;  %p66_p1 = scmp.eq.s32.totalorder %s1817_s29, 0 }
  0x14   : > { %p71_p2 = scmp.ne.s32.totalorder %s1801_s25, %s1797_s24  ;;  %p2357_p3 = scmp.eq.s32.totalorder %s1908_s30, 0 }
  0x15   : > { %p261_p4 = scmp.eq.s32.totalorder %s1908_s30, 1  ;;  %p1919_p5 = por %p66_p1, %p65_p0 }
  0x16   : > { %p267_p6 = scmp.eq.s32.totalorder %s1255_s8, 1  ;;  %p1925_p7 = por %p2357_p3, %p71_p2 }
  0x17   : > { %p1929_p8 = por %p261_p4, %p65_p0  ;;  %p1256_p10 = scmp.ge.s32.totalorder %s1817_s29, 1 }
  0x18   : > { %s2393_s11 = scalar_select %p1925_p7, 1, 0 }
  0x19   : > { %s2395_s12 = scalar_select %p1929_p8, 1, 0 }
  0x1a   : > { %2394 = sst [smem:[#allocation25_spill]] %s2393_s11  ;;  %p1933_p9 = por %p267_p6, %p71_p2 }
  0x1b   : > { %2396 = sst [smem:[#allocation26_spill]] %s2395_s12  ;;  %p274_p11 = scmp.lt.s32.totalorder %s1817_s29, 3 }
  0x1c   : > { %s2397_s13 = scalar_select %p1933_p9, 1, 0 }
  0x1d   : > { %p1939_p12 = pnand %p1256_p10, %p274_p11  ;;  %s1819_s15 = smov [#allocation5]  }
  0x1e   : > { %2398 = sst [smem:[#allocation27_spill]] %s2397_s13  ;;  %s289_s16 = sshll.u32 %s1819_s15, 4  ;;  %s1943_s16 = int_to_ptr.vmem [resolvable:$true] %s289_s16 }
  0x1f   : > { %s2399_s14 = scalar_select %p1939_p12, 1, 0 }
  0x20   : > { %p1401_p13 = pneg %p1939_p12  ;;  %s1820_s18 = smov [#allocation13]  }
  0x21   : > { %s318_s19 = sshll.u32 %s1820_s18, 4  ;;  %s2401_s1 = sld [smem:[#allocation30_spill]]  ;;  %s1954_s19 = int_to_ptr.vmem [resolvable:$true] %s318_s19 }
  0x22   : > { %p1950_p1 = pnand %p1401_p13, %p2357_p3 }
  0x24   : > { %s2400_s17 = scalar_select %p1950_p1, 1, 0 }
  0x25   : > { %p1965_p4 = pneg %p1950_p1 }
  0x27   : > { %s1515_s23 = scalar_lea.hbm %s2401_s1, 256 }
  0x28   : > { %p1516_p2 = scmp.ne.s32.totalorder %s2401_s1, %s1515_s23  ;;  %p1522_p11 = scmp.lt.u32.totalorder %s1515_s23, %s2401_s1 }
  0x29   : > { %s2402_s9 = scalar_select %p1965_p4, 1, 0 }
  0x2a   : > { %p1518_p6 = pnand %p1965_p4, %p1516_p2 }
  0x2c   : > { %p1519_p10 = pneg %p1518_p6 }
  0x2e   : > { %p1524_p13 = pnand %p1522_p11, %p1519_p10 }
  0x30   : > { %1527 = shalt.err (!%p1524_p13)
}
  0x31   : > { %s1528_s21 = scalar_lea.vmem %s1943_s16, 256  ;;  %p1536_p8 = scmp.lt.s32.totalorder %s1943_s16, %s1943_s16 }
  0x32   : > { %p1529_p0 = scmp.ne.s32.totalorder %s1943_s16, %s1528_s21  ;;  %p1537_p7 = scmp.lt.s32.totalorder %s1528_s21, %s1528_s21 }
  0x34   : > { %p1531_p3 = pnand %p1529_p0, %p1965_p4  ;;  %p1538_p2 = por %p1537_p7, %p1536_p8 }
  0x36   : > { %p1532_p9 = pneg %p1531_p3 }
  0x38   : > { %p1539_p6 = pnand %p1538_p2, %p1532_p9 }
  0x3a   : > { %1542 = shalt.err (!%p1539_p6)
}
  0x3b   : > { %s2364_s22 = smov 64   ;;  %s2366_s13 = smov 4  }
  0x3c   : > { %1404 = dma.hbm_to_vmem [thread:$0]  (!%p1950_p1), %s2401_s1, 256, %s1943_s16, [#allocation6], %s2364_s22, %s2364_s22, %s2366_s13  }
  0x3d   : > { %s2403_s6 = sld [smem:[#allocation32_spill]] }
  0x43   : > { %s1543_s21 = scalar_lea.hbm %s2403_s6, 64 }
  0x44   : > { %p1544_p3 = scmp.ne.s32.totalorder %s2403_s6, %s1543_s21  ;;  %p1550_p9 = scmp.lt.u32.totalorder %s1543_s21, %s2403_s6 }
  0x46   : > { %p1546_p7 = pnand %p1544_p3, %p1965_p4 }
  0x48   : > { %p1547_p8 = pneg %p1546_p7 }
  0x4a   : > { %p1552_p0 = pnand %p1550_p9, %p1547_p8 }
  0x4c   : > { %1555 = shalt.err (!%p1552_p0)
}
  0x4d   : > { %s1556_s16 = scalar_lea.vmem %s1954_s19, 64  ;;  %p1564_p2 = scmp.lt.s32.totalorder %s1954_s19, %s1954_s19 }
  0x4e   : > { %p1557_p10 = scmp.ne.s32.totalorder %s1954_s19, %s1556_s16  ;;  %p1565_p6 = scmp.lt.s32.totalorder %s1556_s16, %s1556_s16 }
  0x50   : > { %p1559_p11 = pnand %p1557_p10, %p1965_p4  ;;  %p1566_p3 = por %p1565_p6, %p1564_p2 }
  0x52   : > { %p1560_p13 = pneg %p1559_p11 }
  0x54   : > { %p1567_p7 = pnand %p1566_p3, %p1560_p13 }
  0x56   : > { %1570 = shalt.err (!%p1567_p7)
}
  0x57   : > { %1410 = dma.hbm_to_vmem [thread:$0]  (!%p1950_p1), %s2403_s6, 64, %s1954_s19, [#allocation12]  }
  0x58   : > { %s2404_s12 = sadd.s32 1, %s1813_s28  ;;  %p1431_p9 = scmp.lt.s32.totalorder %s1817_s29, 2 }
  0x59   : > { %p51_p8 = scmp.ge.s32.totalorder %s2404_s12, 2  ;;  %s2016_s20 = sand.u32 1, %s1805_s26  }
  0x5a   : > { %s2370_s23 = sand.u32 1, %s1817_s29   ;;  %s2405_s8 = smov %s2404_s12 }
  0x5b   : > { %s2445_s8 = smov (%p51_p8, %s2405_s8), 0  ;;  %p2025_p0 = pnand %p1431_p9, %p1919_p5 }
  0x5c   : > { %2406 = sst [smem:[#allocation28_spill]] %s2445_s8  ;;  %s53_s19 = ssub.s32 %s1813_s28, %s2445_s8 }
  0x5d   : > { %s2407_s15 = scalar_select %p2025_p0, 1, 0 }
  0x5e   : > { %s2368_s18 = sshll.u32 %s2016_s20, 4  ;;  %p56_p10 = scmp.eq.s32.totalorder %s53_s19, 0 }
  0x5f   : > { %s2369_s21 = sshll.u32 %s1813_s28, 8  ;;  %s2408_s16 = sadd.s32 1, %s1805_s26 }
  0x60   : > { %s2036_s7 = scalar_select %p56_p10, %s1805_s26, %s2408_s16  }
  0x61   : > { %s2410_s3 = sld [smem:[#allocation31_spill]]  ;;  %s352_s10 = scalar_lea.vmem [#allocation8], %s2368_s18 }
  0x62   : > { %2409 = sst [smem:[#allocation29_spill]] %s2036_s7  ;;  %s361_s13 = sshll.u32 %s352_s10, 4  ;;  %s2047_s13 = int_to_ptr.vmem [resolvable:$true] %s361_s13 }
  0x63   : > { %s2051_s19 = scalar_lea.sflag [#allocation9], %s2370_s23  ;;  %p2057_p11 = pneg %p2025_p0 }
  0x67   : > { %s2043_s22 = scalar_lea.hbm %s2410_s3, %s2369_s21  ;;  %s1576_s10 = scalar_lea.hbm %s2410_s3, 512 }
  0x68   : > { %s1571_s16 = scalar_lea.hbm %s2043_s22, 256  ;;  %p1577_p6 = scmp.lt.u32.totalorder %s2043_s22, %s2410_s3 }
  0x69   : > { %p1572_p5 = scmp.ne.s32.totalorder %s2043_s22, %s1571_s16  ;;  %p1578_p3 = scmp.lt.u32.totalorder %s1576_s10, %s1571_s16 }
  0x6a   : > { %p1580_p8 = scmp.lt.u32.totalorder %s1571_s16, %s2043_s22 }
  0x6b   : > { %p1574_p13 = pnand %p2057_p11, %p1572_p5  ;;  %p1579_p7 = por %p1578_p3, %p1577_p6 }
  0x6d   : > { %p1575_p2 = pneg %p1574_p13  ;;  %p1581_p9 = por %p1580_p8, %p1579_p7 }
  0x6f   : > { %p1582_p10 = pnand %p1581_p9, %p1575_p2 }
  0x71   : > { %1585 = shalt.err (!%p1582_p10)
}
  0x72   : > { %s1586_s23 = scalar_lea.vmem %s2047_s13, 256  ;;  %s1823_s24 = smov [#allocation8]  }
  0x73   : > { %p1587_p5 = scmp.ne.s32.totalorder %s2047_s13, %s1586_s23  ;;  %s1591_s12 = sshll.u32 %s1823_s24, 4  ;;  %s1592_s12 = int_to_ptr.vmem [resolvable:$false] %s1591_s12 }
  0x74   : > { %s1593_s18 = scalar_lea.vmem %s1592_s12, 512  ;;  %p1594_p1 = scmp.lt.s32.totalorder %s2047_s13, %s1592_s12 }
  0x75   : > { %p1589_p13 = pnand %p1587_p5, %p2057_p11  ;;  %p1595_p4 = scmp.lt.s32.totalorder %s1593_s18, %s1586_s23 }
  0x77   : > { %p1590_p12 = pneg %p1589_p13  ;;  %p1596_p6 = por %p1595_p4, %p1594_p1 }
  0x79   : > { %p1597_p3 = pnand %p1596_p6, %p1590_p12 }
  0x7b   : > { %1600 = shalt.err (!%p1597_p3)
}
  0x7c   : > { %s2412_s21 = smov 4   ;;  %s2413_s16 = smov 64  }
  0x7d   : > { %1417 = dma.hbm_to_vmem [thread:$0]  (!%p2025_p0), %s2043_s22, 256, %s2047_s13, %s2051_s19, %s2413_s16, %s2413_s16, %s2412_s21  }
  0x7e   : > { %s2414_s10 = sshll.u32 %s1813_s28, 8  ;;  %s2415_s18 = sshll.u32 %s2016_s20, 4 }
  0x7f   : > { %s2089_s23 = scalar_lea.hbm %s2352_s4, %s2414_s10  ;;  %s375_s3 = scalar_lea.vmem [#allocation10], %s2415_s18 }
  0x80   : > { %s384_s6 = sshll.u32 %s375_s3, 4  ;;  %s1824_s8 = smov [#allocation7]   ;;  %s2093_s6 = int_to_ptr.vmem [resolvable:$true] %s384_s6 }
  0x81   : > { %s305_s7 = sshll.u32 %s1824_s8, 4  ;;  %s1261_s26 = sshll.u32 %s2016_s20, 2  ;;  %s306_s7 = int_to_ptr.vmem [resolvable:$true] %s305_s7 }
  0x82   : > { %s1601_s11 = scalar_lea.hbm %s2350_s2, 16  ;;  %p2416_p1 = scmp.ne.s32.totalorder %s2402_s9, 0 }
  0x83   : > { %p1602_p12 = scmp.ne.s32.totalorder %s2350_s2, %s1601_s11  ;;  %p1608_p7 = scmp.lt.u32.totalorder %s1601_s11, %s2350_s2 }
  0x85   : > { %p1604_p4 = pnand %p1602_p12, %p2416_p1 }
  0x87   : > { %p1605_p2 = pneg %p1604_p4 }
  0x89   : > { %p1610_p8 = pnand %p1608_p7, %p1605_p2 }
  0x8b   : > { %1613 = shalt.err (!%p1610_p8)
}
  0x8c   : > { %s1614_s3 = scalar_lea.vmem %s306_s7, 16  ;;  %s1621_s27 = scalar_lea.vmem %s306_s7, 32 }
  0x8d   : > { %p1615_p9 = scmp.ne.s32.totalorder %s306_s7, %s1614_s3  ;;  %p1622_p13 = scmp.lt.s32.totalorder %s306_s7, %s306_s7 }
  0x8e   : > { %p1623_p6 = scmp.lt.s32.totalorder %s1621_s27, %s1614_s3 }
  0x8f   : > { %p1617_p10 = pnand %p1615_p9, %p2416_p1 }
  0x90   : > { %p1624_p3 = por %p1623_p6, %p1622_p13 }
  0x91   : > { %p1618_p5 = pneg %p1617_p10 }
  0x93   : > { %p1625_p0 = pnand %p1624_p3, %p1618_p5 }
  0x95   : > { %1628 = shalt.err (!%p1625_p0)
}
  0x96   : > { %p2417_p12 = scmp.ne.s32.totalorder %s2400_s17, 0  ;;  %s1262_s9 = sshll.u32 %s1813_s28, 6 }
  0x97   : > { %s2120_s18 = scalar_lea.hbm %s2348_s0, %s1262_s9  ;;  %s333_s17 = scalar_lea.vmem [#allocation2], %s1261_s26 }
  0x98   : > { %1407 = dma.hbm_to_vmem [thread:$0]  (!%p2417_p12), %s2350_s2, 16, %s306_s7, [#allocation6]  }
  0x99   : > { %s341_s22 = sshll.u32 %s333_s17, 4  ;;  %s330_s13 = scalar_lea.sflag [#allocation3], %s2016_s20  ;;  %s342_s22 = int_to_ptr.vmem [resolvable:$true] %s341_s22 }
  0x9a   : > { %s1629_s10 = scalar_lea.hbm %s2120_s18, 64  ;;  %s1634_s3 = scalar_lea.hbm %s2348_s0, 128 }
  0x9b   : > { %p1630_p0 = scmp.ne.s32.totalorder %s2120_s18, %s1629_s10  ;;  %p1635_p2 = scmp.lt.u32.totalorder %s2120_s18, %s2348_s0 }
  0x9c   : > { %p1636_p7 = scmp.lt.u32.totalorder %s1634_s3, %s1629_s10  ;;  %p1638_p9 = scmp.lt.u32.totalorder %s1629_s10, %s2120_s18 }
  0x9d   : > { %p1632_p1 = pnand %p1630_p0, %p2057_p11 }
  0x9e   : > { %p1637_p8 = por %p1636_p7, %p1635_p2 }
  0x9f   : > { %p1633_p4 = pneg %p1632_p1 }
  0xa0   : > { %p1639_p10 = por %p1638_p9, %p1637_p8 }
  0xa2   : > { %p1640_p5 = pnand %p1639_p10, %p1633_p4 }
  0xa4   : > { %1643 = shalt.err (!%p1640_p5)
}
  0xa5   : > { %s1644_s8 = scalar_lea.vmem %s342_s22, 64  ;;  %s1825_s11 = smov [#allocation2]  }
  0xa6   : > { %p1645_p13 = scmp.ne.s32.totalorder %s342_s22, %s1644_s8  ;;  %s1649_s12 = sshll.u32 %s1825_s11, 4  ;;  %s1650_s12 = int_to_ptr.vmem [resolvable:$false] %s1649_s12 }
  0xa7   : > { %s1651_s17 = scalar_lea.vmem %s1650_s12, 128  ;;  %p1652_p12 = scmp.lt.s32.totalorder %s342_s22, %s1650_s12 }
  0xa8   : > { %p1647_p6 = pnand %p1645_p13, %p2057_p11  ;;  %p1653_p0 = scmp.lt.s32.totalorder %s1651_s17, %s1644_s8 }
  0xaa   : > { %p1648_p3 = pneg %p1647_p6  ;;  %p1654_p1 = por %p1653_p0, %p1652_p12 }
  0xac   : > { %p1655_p2 = pnand %p1654_p1, %p1648_p3 }
  0xae   : > { %1658 = shalt.err (!%p1655_p2)
}
  0xaf   : > { %p2418_p7 = scmp.ne.s32.totalorder %s2407_s15, 0  ;;  %s2147_s24 = scalar_lea.hbm %s2353_s5, %s1262_s9 }
  0xb0   : > { %s1659_s3 = scalar_lea.hbm %s2089_s23, 256  ;;  %s1664_s8 = scalar_lea.hbm %s2352_s4, 512 }
  0xb1   : > { %1414 = dma.hbm_to_vmem [thread:$0]  (!%p2418_p7), %s2120_s18, 64, %s342_s22, %s330_s13  }
  0xb2   : > { %p1660_p4 = scmp.ne.s32.totalorder %s2089_s23, %s1659_s3  ;;  %p1665_p10 = scmp.lt.u32.totalorder %s2089_s23, %s2352_s4 }
  0xb3   : > { %p1666_p5 = scmp.lt.u32.totalorder %s1664_s8, %s1659_s3  ;;  %p1668_p6 = scmp.lt.u32.totalorder %s1659_s3, %s2089_s23 }
  0xb4   : > { %p1662_p8 = pnand %p1660_p4, %p2057_p11 }
  0xb5   : > { %p1667_p13 = por %p1666_p5, %p1665_p10 }
  0xb6   : > { %p1663_p9 = pneg %p1662_p8 }
  0xb7   : > { %p1669_p3 = por %p1668_p6, %p1667_p13 }
  0xb9   : > { %p1670_p12 = pnand %p1669_p3, %p1663_p9 }
  0xbb   : > { %1673 = shalt.err (!%p1670_p12)
}
  0xbc   : > { %s1674_s9 = scalar_lea.vmem %s2093_s6, 256  ;;  %s1826_s18 = smov [#allocation10]  }
  0xbd   : > { %p1675_p0 = scmp.ne.s32.totalorder %s2093_s6, %s1674_s9  ;;  %s1679_s22 = sshll.u32 %s1826_s18, 4  ;;  %s1680_s22 = int_to_ptr.vmem [resolvable:$false] %s1679_s22 }
  0xbe   : > { %s1681_s13 = scalar_lea.vmem %s1680_s22, 512  ;;  %p1682_p4 = scmp.lt.s32.totalorder %s2093_s6, %s1680_s22 }
  0xbf   : > { %p1677_p1 = pnand %p1675_p0, %p2057_p11  ;;  %p1683_p8 = scmp.lt.s32.totalorder %s1681_s13, %s1674_s9 }
  0xc1   : > { %p1678_p2 = pneg %p1677_p1  ;;  %p1684_p10 = por %p1683_p8, %p1682_p4 }
  0xc3   : > { %p1685_p5 = pnand %p1684_p10, %p1678_p2 }
  0xc5   : > { %1688 = shalt.err (!%p1685_p5)
}
  0xc6   : > { %1420 = dma.hbm_to_vmem [thread:$0]  (!%p2418_p7), %s2089_s23, 256, %s2093_s6, %s2051_s19, %s2413_s16, %s2413_s16, %s2412_s21  }
  0xc7   : > { %s398_s17 = scalar_lea.vmem [#allocation11], %s1261_s26  ;;  %s2419_s7 = sand.u32 1, %s1817_s29  }
  0xc8   : > { %s406_s10 = sshll.u32 %s398_s17, 4  ;;  %s395_s3 = scalar_lea.sflag [#allocation12], %s2419_s7  ;;  %s407_s10 = int_to_ptr.vmem [resolvable:$true] %s406_s10 }
  0xc9   : > { %s1689_s27 = scalar_lea.hbm %s2147_s24, 64  ;;  %s1694_s11 = scalar_lea.hbm %s2353_s5, 128 }
  0xca   : > { %p1690_p9 = scmp.ne.s32.totalorder %s2147_s24, %s1689_s27  ;;  %p1695_p3 = scmp.lt.u32.totalorder %s2147_s24, %s2353_s5 }
  0xcb   : > { %p1696_p12 = scmp.lt.u32.totalorder %s1694_s11, %s1689_s27  ;;  %p1698_p1 = scmp.lt.u32.totalorder %s1689_s27, %s2147_s24 }
  0xcc   : > { %p1692_p13 = pnand %p1690_p9, %p2057_p11 }
  0xcd   : > { %p1697_p0 = por %p1696_p12, %p1695_p3 }
  0xce   : > { %p1693_p6 = pneg %p1692_p13 }
  0xcf   : > { %p1699_p2 = por %p1698_p1, %p1697_p0 }
  0xd1   : > { %p1700_p4 = pnand %p1699_p2, %p1693_p6 }
  0xd3   : > { %1703 = shalt.err (!%p1700_p4)
}
  0xd4   : > { %s1704_s6 = scalar_lea.vmem %s407_s10, 64  ;;  %s1827_s26 = smov [#allocation11]  }
  0xd5   : > { %p1705_p8 = scmp.ne.s32.totalorder %s407_s10, %s1704_s6  ;;  %s1709_s20 = sshll.u32 %s1827_s26, 4  ;;  %s1710_s20 = int_to_ptr.vmem [resolvable:$false] %s1709_s20 }
  0xd6   : > { %s1711_s19 = scalar_lea.vmem %s1710_s20, 128  ;;  %p1712_p9 = scmp.lt.s32.totalorder %s407_s10, %s1710_s20 }
  0xd7   : > { %p1707_p10 = pnand %p1705_p8, %p2057_p11  ;;  %p1713_p13 = scmp.lt.s32.totalorder %s1711_s19, %s1704_s6 }
  0xd9   : > { %p1708_p5 = pneg %p1707_p10  ;;  %p1714_p7 = por %p1713_p13, %p1712_p9 }
  0xdb   : > { %p1715_p3 = pnand %p1714_p7, %p1708_p5 }
  0xdd   : > { %1718 = shalt.err (!%p1715_p3)
}
  0xde   : > { %p2420_p12 = scmp.ne.s32.totalorder %s2407_s15, 0  ;;  %p2421_p6 = scmp.ne.s32.totalorder %s2399_s14, 0 }
  0xdf   : > { %s2422_s1 = sld [smem:[#allocation25_spill]] (!%p2421_p6)  ;;  %s2198_s21 = sand.u32 (!%p2421_p6), 1, %s1801_s25  }
  0xe0   : > { %1423 = dma.hbm_to_vmem [thread:$0]  (!%p2420_p12), %s2147_s24, 64, %s407_s10, %s395_s3  }
  0xe1   : > { %415 = sbr.rel (%p2421_p6) target bundleno = 1482 (0x5ca), region = 48  ;;  %s1272_s16 = sshll.u32 (!%p2421_p6), %s2198_s21, 2 }
  0xe2   : > { %s418_s23 = scalar_lea.sflag (!%p2421_p6), [#allocation3], %s2198_s21  ;;  %s421_s18 = scalar_lea.vmem (!%p2421_p6), [#allocation2], %s1272_s16 }
  0xe5   : > { %p2423_p11 = scmp.ne.s32.totalorder (!%p2421_p6), %s2422_s1, 0 }
  0xe8   : > { %1772 = dma.done.wait (%p2423_p11), %s418_s23, 64  }
  0xe9   : > { %1774 = vsyncadd (%p2423_p11), %s418_s23, 4294967232  ;;  %s2424_s15 = sld [smem:[#allocation24_spill]] }
  0xef   : > { %p2425_p7 = scmp.eq.s32.totalorder %s2424_s15, 0 }
  0xf1   : > { %1776 = dma.done.wait (%p2425_p7), [#allocation6], 272   ;;  %p2426_p0 = pmov %p2425_p7 }
  0xf2   : > { %s434_s14 = sand.u32 1, %s2424_s15   ;;  %s1275_s24 = sshll.u32 %s2198_s21, 4 }
  0xf3   : > { %1778 = vsyncadd (%p2426_p0), [#allocation6], 4294967024  ;;  %s435_s22 = scalar_lea.sflag [#allocation9], %s434_s14  ;;  %s2212_s13 = scalar_lea.vmem [#allocation8], %s1275_s24 }
  0xf4   : > { %1780 = dma.done.wait (%p2423_p11), %s435_s22, 512  }
  0xf5   : > { %1782 = vsyncadd (%p2423_p11), %s435_s22, 4294966784  ;;  %s2218_s17 = scalar_lea.vmem [#allocation10], %s1275_s24  ;;  %s453_s10 = scalar_lea.sflag [#allocation12], %s434_s14 }
  0xf6   : > { %s2220_s7 = scalar_lea.vmem [#allocation11], %s1272_s16 }
  0xf7   : > { %1784 = dma.done.wait (%p2423_p11), %s453_s10, 64  }
  0xf8   : > { %1786 = vsyncadd (%p2423_p11), %s453_s10, 4294967232  ;;  %p2427_p1 = pmov %p2426_p0 }
  0xf9   : > { %p2428_p2 = pmov %p2426_p0 }
  0xfa   : > { %1788 = dma.done.wait (%p2427_p1), [#allocation12], 64  }
  0xfb   : > { %1790 = vsyncadd (%p2428_p2), [#allocation12], 4294967232  ;;  %v1828_v0 = vmov 0.0   ;;  %vm1829_vm0 = vmmov 0   ;;  %v1497_v1 = vld [vmem:[#allocation5] sm:$0xff]   ;;  %v1498_v2 = vld [vmem:[#allocation5 + $0x8] sm:$0xff]  }
  0xfc   : > { %1323 = vmatprep.subr.bf16.mxu0 %v1828_v0  ;;  %1327 = vmatprep.mubr.msk.bf16.mxu0 %vm1829_vm0, %v1828_v0  ;;  %v509_v3 = vld [vmem:[%s421_s18] sm:$0xf]  ;;  %vm533_vm1 = vcmask 261120   ;;  %v582_v4 = vld [vmem:[%s2212_s13] sm:$0xf]  ;;  %vm587_vm2 = vcmask 1043456  }
  0xfd   : > { %1331 = vmatprep.subr.bf16.mxu1 %v1828_v0  ;;  %1333 = vmatprep.mubr.msk.bf16.mxu1 %vm1829_vm0, %v1828_v0  ;;  %v589_v5 = vsel %vm587_vm2, %v582_v4, 0  ;;  %v1286_v6 = vld [vmem:[%s2212_s13 + $0x4] sm:$0xf]  ;;  %v1280_v8 = vld [vmem:[#allocation7] ss:$0 sm:$0xff]  ;;  %vm583_vm3 = vcmask 64512  }
  0xfe   : > { %1324 = vmatpush3.bf16.msra.mxu0 %v1497_v1  ;;  %1332 = vmatpush3.bf16.msra.mxu1 %v589_v5  ;;  %v701_v7 = vsel %vm587_vm2, %v1286_v6, 0  ;;  %s1830_s3 = smov 104   ;;  %s1831_s27 = smov 120   ;;  %v1290_v15 = vld [vmem:[%s2212_s13 + $0x8] sm:$0xf]  ;;  %vm1042_vm4 = vcmask 130048  }
  0xff   : > { %1325 = vmatprep.subr.bf16.mxu0 %v1828_v0  ;;  %1337 = vmatprep.subr.bf16.mxu1 %v1828_v0  ;;  %s1832_s30 = smov 112   ;;  %v813_v16 = vsel %vm587_vm2, %v1290_v15, 0  ;;  %v1294_v18 = vld [vmem:[%s2212_s13 + $0xc] sm:$0xf]  ;;  %v579_v22 = vld [vmem:[#allocation13] sm:$0xf] }
 0x100   : > { %v925_v19 = vsel %vm587_vm2, %v1294_v18, 0  ;;  %v577_v23 = vld [vmem:[%s2220_s7] sm:$0xf]  ;;  %v580_v24 = vunpack.c.l.bf16 %v579_v22  ;;  %v1288_v15 = vld [vmem:[%s2218_s17 + $0x4] sm:$0xf]  ;;  %s1833_s8 = smov 8  }
 0x101   : > { %v578_v25 = vunpack.c.l.bf16 %v577_v23  ;;  %v645_v59 = vld [vmem:[%s2218_s17] sm:$0xf]  ;;  %v763_v18 = vsel %vm587_vm2, %v1288_v15, 0  ;;  %v1292_v22 = vld [vmem:[%s2218_s17 + $0x8] sm:$0xf]  ;;  %s2429_s11 = sld [smem:[#allocation23_spill]] }
 0x102   : > { %1326 = vmatpush3.bf16.msra.mxu0 %v1498_v2  ;;  %v650_v60 = vsel %vm587_vm2, %v645_v59, 0  ;;  %s1834_s12 = smov 16   ;;  %s1835_s9 = smov 24   ;;  %vm1044_vm5 = vcmask 195584  }
 0x103   : > { %1343 = vmatprep.subr.bf16.mxu0 %v1828_v0  ;;  %s1279_s6 = sshll.u32 %s2198_s21, 3  ;;  %s2430_s26 = sld [smem:[#allocation26_spill]] }
 0x104   : > { %s505_s19 = scalar_lea.vmem [#allocation14], %s1279_s6  ;;  %s2431_s18 = sld [smem:[#allocation33_spill]] }
 0x105   : > { %1328 = vmatmul.mubr.msk.bf16.vlgmr.msra.gmra.mrb[0].mxu0 %vm533_vm1, %v509_v3  ;;  %s1063_s1 = sshll.u32 %s505_s19, 4  ;;  %s1048_s14 = scalar_lea.sflag [#allocation4], %s2198_s21  ;;  %s2300_s1 = int_to_ptr.vmem [resolvable:$true] %s1063_s1 }
 0x106   : > { %1345 = vmatprep.mubr.msk.bf16.mxu0 %vm1829_vm0, %v1828_v0  ;;  %1344 = vmatpush3.bf16.msra.mxu0 %v701_v7  ;;  %s1719_s24 = scalar_lea.vmem %s2300_s1, 128  ;;  %s1836_s22 = smov [#allocation14]  }
 0x107   : > { %1355 = vmatprep.subr.bf16.mxu0 %v1828_v0  ;;  %s1299_s20 = sshll.u32 %s2429_s11, 7  ;;  %p1720_p4 = scmp.ne.s32.totalorder %s2300_s1, %s1719_s24 }
 0x108   : > { %s1723_s13 = sshll.u32 %s1836_s22, 4  ;;  %s1724_s13 = int_to_ptr.vmem [resolvable:$false] %s1723_s13 }
 0x109   : > { %p2432_p8 = scmp.ne.s32.totalorder %s2430_s26, 0  ;;  %p1726_p9 = scmp.lt.s32.totalorder %s2300_s1, %s1724_s13 }
 0x10a   : > { %s2298_s15 = scalar_lea.hbm %s2431_s18, %s1299_s20 }
 0x10b   : > { %p1721_p10 = pnand %p1720_p4, %p2432_p8 }
 0x10d   : > { %p1722_p5 = pneg %p1721_p10 }
 0x1d8   : > { %v571_v9 = vpop.f32.mrb[0].mxu0 }
 0x1d9   : > { %v572_v10 = vadd.f32 %v1280_v8, %v571_v9  ;;  %v1329_v11 = vpop.f32.mrb[1].mxu0 }
 0x1da   : > { %v574_v12 = vpop.f32.mrb[2].mxu0 }
 0x1db   : > { %v581_v13 = vpack.c.bf16 %v572_v10, %v572_v10  ;;  %v1330_v14 = vpop.f32.mrb[3].mxu0 }
 0x1dd   : > { %919 = vrot.lane.b32.xlu1 %v581_v13, %s1830_s3  ;;  %695 = vrot.lane.b32.xlu0 %v581_v13, %s1831_s27 }
 0x1de   : > { %1334 = vmatmul.mubr.msk.bf16.vlgmr.msra.gmra.mrb[0].mxu1 %vm583_vm3, %v581_v13 }
 0x1df   : > { %1339 = vmatprep.mubr.msk.bf16.mxu1 %vm1829_vm0, %v1828_v0  ;;  %1338 = vmatpush3.bf16.msra.mxu1 %v650_v60 }
 0x1e0   : > { %1349 = vmatprep.subr.bf16.mxu1 %v1828_v0 }
 0x1e1   : > { %807 = vrot.lane.b32.xlu0 %v581_v13, %s1832_s30 }
 0x24f   : > { %v696_v17 = vpop.permute.xlu0 %695  ;;  %v920_v21 = vpop.permute.xlu1 %919 }
 0x250   : > { %1346 = vmatmul.mubr.msk.bf16.vlgmr.msra.gmra.mrb[4].mxu0 %vm583_vm3, %v696_v17 }
 0x251   : > { %1356 = vmatpush3.bf16.msra.mxu0 %v813_v16  ;;  %1357 = vmatprep.mubr.msk.bf16.mxu0 %vm1829_vm0, %v1828_v0 }
 0x252   : > { %1367 = vmatprep.subr.bf16.mxu0 %v1828_v0 }
 0x253   : > { %v808_v20 = vpop.permute.xlu0 %807 }
 0x258   : > { %1358 = vmatmul.mubr.msk.bf16.vlgmr.msra.gmra.mrb[8].mxu0 %vm583_vm3, %v808_v20 }
 0x259   : > { %1368 = vmatpush3.bf16.msra.mxu0 %v925_v19  ;;  %1369 = vmatprep.mubr.msk.bf16.mxu0 %vm1829_vm0, %v1828_v0 }
 0x260   : > { %1370 = vmatmul.mubr.msk.bf16.vlgmr.msra.gmra.mrb[12].mxu0 %vm583_vm3, %v920_v21 }
 0x2b1   : > { %v625_v26 = vpop.f32.mrb[0].mxu1 }
 0x2b2   : > { %v631_v27 = vmul.f32 %v625_v26, %v580_v24  ;;  %v1335_v28 = vpop.f32.mrb[1].mxu1 }
 0x2b3   : > { %v628_v29 = vpop.f32.mrb[2].mxu1  ;;  %v1296_v28 = vld [vmem:[%s2218_s17 + $0xc] sm:$0xf]  ;;  %s1725_s17 = scalar_lea.vmem %s1724_s13, 256 }
 0x2b4   : > { %v1336_v30 = vpop.f32.mrb[3].mxu1  ;;  %v632_v31 = vadd.f32 %v631_v27, %v578_v25  ;;  %p1727_p13 = scmp.lt.s32.totalorder %s1725_s17, %s1719_s24 }
 0x2b6   : > { %v633_v32 = vsel %vm583_vm3, %v632_v31, -inf  ;;  %p1728_p3 = por %p1727_p13, %p1726_p9 }
 0x2b7   : > { %634 = vmax.xlane.f32.xlu1 %v633_v32 }
 0x2b8   : > { %p1729_p12 = pnand %p1728_p3, %p1722_p5 }
 0x323   : > { %v737_v33 = vpop.f32.mrb[4].mxu0 }
 0x324   : > { %v743_v34 = vmul.f32 %v737_v33, %v580_v24  ;;  %v1347_v35 = vpop.f32.mrb[5].mxu0 }
 0x325   : > { %v740_v36 = vpop.f32.mrb[6].mxu0 }
 0x326   : > { %v1348_v37 = vpop.f32.mrb[7].mxu0  ;;  %v744_v38 = vadd.f32 %v743_v34, %v578_v25 }
 0x328   : > { %v745_v39 = vsel %vm583_vm3, %v744_v38, -inf }
 0x329   : > { %746 = vmax.xlane.f32.xlu0 %v745_v39 }
 0x32b   : > { %v849_v40 = vpop.f32.mrb[8].mxu0 }
 0x32c   : > { %v855_v41 = vmul.f32 %v849_v40, %v580_v24  ;;  %v1359_v42 = vpop.f32.mrb[9].mxu0 }
 0x32d   : > { %v852_v43 = vpop.f32.mrb[10].mxu0 }
 0x32e   : > { %v1360_v44 = vpop.f32.mrb[11].mxu0  ;;  %v856_v45 = vadd.f32 %v855_v41, %v578_v25 }
 0x330   : > { %v857_v46 = vsel %vm583_vm3, %v856_v45, -inf }
 0x331   : > { %858 = vmax.xlane.f32.xlu0 %v857_v46 }
 0x333   : > { %v961_v47 = vpop.f32.mrb[12].mxu0 }
 0x334   : > { %v967_v48 = vmul.f32 %v961_v47, %v580_v24  ;;  %v1371_v49 = vpop.f32.mrb[13].mxu0 }
 0x335   : > { %v964_v50 = vpop.f32.mrb[14].mxu0 }
 0x336   : > { %v1372_v51 = vpop.f32.mrb[15].mxu0  ;;  %v968_v52 = vadd.f32 %v967_v48, %v578_v25  ;;  %v875_v25 = vsel %vm587_vm2, %v1292_v22, 0 }
 0x338   : > { %v969_v53 = vsel %vm583_vm3, %v968_v52, -inf }
 0x339   : > { %970 = vmax.xlane.f32.xlu1 %v969_v53 }
 0x344   : > { %v635_v54 = vpop.xlane.xlu1 %634 }
 0x345   : > { %v636_v55 = vsub.f32 %v632_v31, %v635_v54  ;;  %v987_v31 = vsel %vm587_vm2, %v1296_v28, 0 }
 0x347   : > { %v637_v56 = vmul.f32 1.442695, %v636_v55 }
 0x349   : > { %1499 = vpow2.f32 %v637_v56 }
 0x353   : > { %v1500_v57 = vpop.eup %1499 }
 0x354   : > { %v639_v58 = vsel %vm583_vm3, %v1500_v57, 0.0 }
 0x355   : > { %640 = vadd.xlane.f32.xlu0 %v639_v58 }
 0x3b6   : > { %v747_v61 = vpop.xlane.xlu0 %746 }
 0x3b7   : > { %v748_v62 = vsub.f32 %v744_v38, %v747_v61 }
 0x3b9   : > { %v749_v63 = vmul.f32 1.442695, %v748_v62 }
 0x3bb   : > { %1501 = vpow2.f32 %v749_v63 }
 0x3be   : > { %v859_v1 = vpop.xlane.xlu0 %858 }
 0x3bf   : > { %v860_v2 = vsub.f32 %v856_v45, %v859_v1 }
 0x3c1   : > { %v861_v3 = vmul.f32 1.442695, %v860_v2 }
 0x3c3   : > { %1503 = vpow2.f32 %v861_v3 }
 0x3c5   : > { %v1502_v4 = vpop.eup %1501 }
 0x3c6   : > { %v971_v5 = vpop.xlane.xlu1 %970  ;;  %v751_v6 = vsel %vm583_vm3, %v1502_v4, 0.0 }
 0x3c7   : > { %v972_v7 = vsub.f32 %v968_v52, %v971_v5  ;;  %752 = vadd.xlane.f32.xlu1 %v751_v6 }
 0x3c9   : > { %v973_v8 = vmul.f32 1.442695, %v972_v7 }
 0x3cb   : > { %1505 = vpow2.f32 %v973_v8 }
 0x3cd   : > { %v1504_v9 = vpop.eup %1503 }
 0x3ce   : > { %v863_v10 = vsel %vm583_vm3, %v1504_v9, 0.0 }
 0x3cf   : > { %864 = vadd.xlane.f32.xlu0 %v863_v10 }
 0x3d5   : > { %v1506_v11 = vpop.eup %1505 }
 0x3d6   : > { %v975_v12 = vsel %vm583_vm3, %v1506_v11, 0.0 }
 0x3d7   : > { %976 = vadd.xlane.f32.xlu1 %v975_v12 }
 0x3e2   : > { %v641_v13 = vpop.xlane.xlu0 %640 }
 0x3e3   : > { %1507 = vrcp.f32 %v641_v13 }
 0x3ed   : > { %v1508_v14 = vpop.eup %1507 }
 0x3ee   : > { %v643_v16 = vmul.f32 %v1508_v14, %v1500_v57 }
 0x3f0   : > { %v644_v17 = vpack.c.bf16 %v643_v16, %v643_v16 }
 0x3f2   : > { %1340 = vmatmul.mubr.msk.bf16.vlgmr.msra.gmra.mrb[4].mxu1 %vm583_vm3, %v644_v17 }
 0x3f3   : > { %1350 = vmatpush3.bf16.msra.mxu1 %v763_v18  ;;  %1351 = vmatprep.mubr.msk.bf16.mxu1 %vm1829_vm0, %v1828_v0 }
 0x3f4   : > { %1361 = vmatprep.subr.bf16.mxu1 %v1828_v0 }
 0x454   : > { %v753_v19 = vpop.xlane.xlu1 %752 }
 0x455   : > { %1509 = vrcp.f32 %v753_v19 }
 0x45c   : > { %v865_v20 = vpop.xlane.xlu0 %864 }
 0x45d   : > { %1511 = vrcp.f32 %v865_v20 }
 0x45f   : > { %v1510_v21 = vpop.eup %1509 }
 0x460   : > { %v755_v23 = vmul.f32 %v1510_v21, %v1502_v4 }
 0x462   : > { %v756_v24 = vpack.c.bf16 %v755_v23, %v755_v23 }
 0x464   : > { %1352 = vmatmul.mubr.msk.bf16.vlgmr.msra.gmra.mrb[8].mxu1 %vm583_vm3, %v756_v24  ;;  %v977_v26 = vpop.xlane.xlu1 %976 }
 0x465   : > { %1362 = vmatpush3.bf16.msra.mxu1 %v875_v25  ;;  %1513 = vrcp.f32 %v977_v26  ;;  %1363 = vmatprep.mubr.msk.bf16.mxu1 %vm1829_vm0, %v1828_v0 }
 0x466   : > { %1373 = vmatprep.subr.bf16.mxu1 %v1828_v0 }
 0x467   : > { %v1512_v27 = vpop.eup %1511 }
 0x468   : > { %v867_v29 = vmul.f32 %v1512_v27, %v1504_v9 }
 0x46a   : > { %v868_v30 = vpack.c.bf16 %v867_v29, %v867_v29 }
 0x46c   : > { %1364 = vmatmul.mubr.msk.bf16.vlgmr.msra.gmra.mrb[12].mxu1 %vm583_vm3, %v868_v30 }
 0x46d   : > { %1374 = vmatpush3.bf16.msra.mxu1 %v987_v31  ;;  %1375 = vmatprep.mubr.msk.bf16.mxu1 %vm1829_vm0, %v1828_v0 }
 0x46f   : > { %v1514_v32 = vpop.eup %1513 }
 0x470   : > { %v979_v33 = vmul.f32 %v1514_v32, %v1506_v11 }
 0x472   : > { %v980_v34 = vpack.c.bf16 %v979_v33, %v979_v33 }
 0x474   : > { %1376 = vmatmul.mubr.msk.bf16.vlgmr.msra.gmra.mrb[16].mxu1 %vm583_vm3, %v980_v34 }
 0x4c5   : > { %v686_v35 = vpop.f32.mrb[4].mxu1 }
 0x4c6   : > { %v1341_v36 = vpop.f32.mrb[5].mxu1 }
 0x4c7   : > { %v689_v37 = vpop.f32.mrb[6].mxu1 }
 0x4c8   : > { %v1342_v38 = vpop.f32.mrb[7].mxu1 }
 0x537   : > { %v799_v39 = vpop.f32.mrb[8].mxu1 }
 0x538   : > { %1030 = vrot.lane.b32.xlu0 %v799_v39, %s1833_s8  ;;  %v1353_v40 = vpop.f32.mrb[9].mxu1 }
 0x539   : > { %v802_v41 = vpop.f32.mrb[10].mxu1 }
 0x53a   : > { %v1354_v42 = vpop.f32.mrb[11].mxu1 }
 0x53f   : > { %v911_v43 = vpop.f32.mrb[12].mxu1 }
 0x540   : > { %1034 = vrot.lane.b32.xlu1 %v911_v43, %s1834_s12  ;;  %v1365_v0 = vpop.f32.mrb[13].mxu1 }
 0x541   : > { %v914_v44 = vpop.f32.mrb[14].mxu1 }
 0x542   : > { %v1366_v45 = vpop.f32.mrb[15].mxu1 }
 0x547   : > { %v1023_v46 = vpop.f32.mrb[16].mxu1 }
 0x548   : > { %1038 = vrot.lane.b32.xlu1 %v1023_v46, %s1835_s9  ;;  %v1377_v47 = vpop.f32.mrb[17].mxu1 }
 0x549   : > { %v1026_v48 = vpop.f32.mrb[18].mxu1 }
 0x54a   : > { %v1378_v49 = vpop.f32.mrb[19].mxu1 }
 0x5aa   : > { %v1031_v50 = vpop.permute.xlu0 %1030 }
 0x5ab   : > { %v1041_v52 = vsel %vm583_vm3, %v686_v35, %v1031_v50 }
 0x5b2   : > { %v1035_v51 = vpop.permute.xlu1 %1034 }
 0x5b3   : > { %v1043_v53 = vsel %vm1042_vm4, %v1041_v52, %v1035_v51 }
 0x5ba   : > { %v1039_v54 = vpop.permute.xlu1 %1038 }
 0x5bb   : > { %v1045_v55 = vsel %vm1044_vm5, %v1043_v53, %v1039_v54 }
 0x5bc   : > { %1046 = vst.msk [vmem:[%s505_s19] sm:$0xff] %vm533_vm1, %v1045_v55 }
 0x5bd   : > { %1732 = shalt.err (!%p1729_p12)
}
 0x5be   : > { %s1733_s21 = scalar_lea.hbm %s2298_s15, 128  ;;  %s1737_s3 = scalar_lea.hbm %s2431_s18, 256 }
 0x5bf   : > { %p1734_p6 = scmp.ne.s32.totalorder %s2298_s15, %s1733_s21  ;;  %p1738_p0 = scmp.lt.u32.totalorder %s2298_s15, %s2431_s18 }
 0x5c0   : > { %p1739_p1 = scmp.lt.u32.totalorder %s1737_s3, %s1733_s21  ;;  %p1741_p4 = scmp.lt.u32.totalorder %s1733_s21, %s2298_s15 }
 0x5c1   : > { %p1735_p11 = pnand %p1734_p6, %p2432_p8 }
 0x5c2   : > { %p1740_p2 = por %p1739_p1, %p1738_p0 }
 0x5c3   : > { %p1736_p7 = pneg %p1735_p11 }
 0x5c4   : > { %p1742_p10 = por %p1741_p4, %p1740_p2 }
 0x5c6   : > { %p1743_p5 = pnand %p1742_p10, %p1736_p7 }
 0x5c8   : > { %1746 = shalt.err (!%p1743_p5)
}
 0x5c9   : > { %1399 = dma.vmem_to_hbm [thread:$0]  (%p2432_p8), %s2300_s1, 128, %s2298_s15, %s1048_s14  }
 0x5ca PF: > { %s2433_s8 = sld [smem:[#allocation21_spill]]  ;;  %s2434_s11 = sld [smem:[#allocation27_spill]] }
 0x5cb   : > { %p2436_p13 = scmp.ge.s32.totalorder %s1817_s29, 2 }
 0x5d0   : > { %s1075_s12 = sand.u32 1, %s2433_s8   ;;  %p2435_p9 = scmp.ne.s32.totalorder %s2434_s11, 0 }
 0x5d1   : > { %s1076_s9 = scalar_lea.sflag [#allocation4], %s1075_s12 }
 0x5d2   : > { %p1425_p3 = pnand %p2436_p13, %p2435_p9 }
 0x5d4   : > { %1792 = dma.done.wait (!%p1425_p3), %s1076_s9, 128  }
 0x5d5   : > { %1794 = vsyncadd (!%p1425_p3), %s1076_s9, 4294967168  ;;  %s30_s29 = sadd.s32 1, %s1817_s29   ;;  %s2437_s6 = sld [smem:[#allocation22_spill]] }
 0x5d6   : > { %p27_p12 = scmp.ge.s32.totalorder %s30_s29, 4   ;;  %s2438_s26 = sld [smem:[#allocation29_spill]] }
 0x5d7   : > { %s2439_s20 = sld [smem:[#allocation28_spill]]  ;;  %s2440_s24 = smov %s1801_s25 }
 0x5d8   : > { %s2442_s27 = smov %s1813_s28  ;;  %29 = sbr.rel (!%p27_p12) target bundleno = 16 (0x10), region = 151 }
 0x5db   : > { %s2441_s25 = smov %s2437_s6 }
 0x5dd   : > { %s2443_s28 = smov %s2439_s20 }
 0x5df   :  { %1081 = vsyncpa [#allocation3], 1 }
 0x5e0   :  { %1083 = vsyncpa [#allocation3 + $0x1], 1 }
 0x5e1   :  { %1084 = vsyncpa [#allocation6], 1 }
 0x5e2   :  { %1085 = vsyncpa [#allocation9], 1 }
 0x5e3   :  { %1087 = vsyncpa [#allocation9 + $0x1], 1 }
 0x5e4   :  { %1088 = vsyncpa [#allocation12], 1 }
 0x5e5   :  { %1090 = vsyncpa [#allocation12 + $0x1], 1 }
 0x5e6   :  { %1091 = vsyncpa [#allocation4], 1 }
 0x5e7   :  { %1093 = vsyncpa [#allocation4 + $0x1], 1 }

</bundles_post_ra>
